<compile_context>
chip_gen: v7x
topology: tpu7x:2x2x1
jax: 0.10.0
libtpu: 0.0.40
codegen_flags: <defaults>
</compile_context>

<pallas_src>
import functools

import jax
import jax.numpy as jnp
from jax.experimental import pallas as pl
from jax.experimental.pallas import tpu as pltpu

_INV_SQRT2 = 0.7071067811865476


def _round_up(n, m):
    return ((n + m - 1) // m) * m


def _pad2(a, rows, cols):
    return jnp.pad(a, ((0, rows - a.shape[0]), (0, cols - a.shape[1])))


def _gelu_exact(x):
    # nn.GELU() default = exact erf-based GELU (f32 math, VALU polynomial).
    return 0.5 * x * (1.0 + jax.lax.erf(x * jnp.float32(_INV_SQRT2)))


def _gelu_tanh(x):
    # Optional tanh approximation (EUP path); slightly different numerics.
    return jax.nn.gelu(x, approximate=True)


def _vmem_capacity_bytes():
    try:
        info = pltpu.get_tpu_info()
        cap = getattr(info, "vmem_capacity_bytes", None)
        if cap:
            return int(cap)
    except Exception:
        pass
    return 128 * 2**20  # v5e/v6e default


def _pick_batch_tile(B, target, align):
    """Largest tile <= target that is a multiple of `align` and divides B exactly
    (avoids batch padding); falls back to round_up(B, align) capped at target."""
    hi = min(target, B)
    for t in range(hi, align - 1, -1):
        if t % align == 0 and B % t == 0:
            return t
    return min(target, _round_up(B, align))


def vae_encoder_kernel(x_ref,
                       w1_ref, b1_ref,
                       w2_ref, b2_ref,
                       w3_ref, b3_ref,
                       wh_ref, bh_ref,
                       out_ref, *, approximate_gelu):
    gelu = _gelu_tanh if approximate_gelu else _gelu_exact
    cd = w1_ref.dtype  # MXU compute dtype (bf16 by default)

    # Per-tile f32 -> bf16 cast (free VPU work; avoids a wrapper-side HBM pass).
    x = x_ref[...].astype(cd)

    # encoder layer 1: Linear -> GELU -> (Dropout = identity in eval)
    h = jnp.dot(x, w1_ref[...], preferred_element_type=jnp.float32) + b1_ref[...]
    h = gelu(h).astype(cd)

    # encoder layer 2
    h = jnp.dot(h, w2_ref[...], preferred_element_type=jnp.float32) + b2_ref[...]
    h = gelu(h).astype(cd)

    # encoder layer 3 (hidden_dim -> hidden_dim // 2)
    h = jnp.dot(h, w3_ref[...], preferred_element_type=jnp.float32) + b3_ref[...]
    h = gelu(h).astype(cd)

    # fused heads: [mu | logvar] in one lane-dense matmul / store
    out_ref[...] = (jnp.dot(h, wh_ref[...], preferred_element_type=jnp.float32)
                    + bh_ref[...]).astype(out_ref.dtype)


def vae_encoder_forward(x, params, *, compute_dtype=jnp.bfloat16,
                        approximate_gelu=False, batch_tile=None,
                        feature_align=128, out_dtype=jnp.float32):
    """x: (B, input_dim) float32.  params: (in, out) weights, (1, out) biases.

    Returns (mu, logvar), each (B, latent_dim) float32.
    """
    B, input_dim = x.shape
    hidden_dim = params["w1"].shape[1]
    half_dim = params["w3"].shape[1]
    latent_dim = params["wmu"].shape[1]
    head_dim = 2 * latent_dim

    cd = jnp.dtype(compute_dtype)
    od = jnp.dtype(out_dtype)
    cap = _vmem_capacity_bytes()

    # ---- lane-dense padding of weight OUTPUT dims (x itself stays unpadded) ----
    # feature_align=256 packs the 2x256x256 MXU on v6e/v7x; 128 is always safe.
    h_p = _round_up(hidden_dim, feature_align)
    h2_p = _round_up(half_dim, feature_align)
    head_p = _round_up(head_dim, 128)

    # ---- batch tiling ----
    if batch_tile is None:
        batch_tile = 256 if cap <= 64 * 2**20 else 512   # v7x vs v5e/v6e
    align = 16 if B >= 16 else 8
    TB = _pick_batch_tile(B, batch_tile, align)
    Bp = _round_up(B, TB)
    # Guarantee >= 2 grid steps when B allows, so ("parallel",) shards across
    # both v7x TensorCores (near-zero cost on single-TC v5e/v6e).
    if Bp // TB == 1 and B >= 2 * align:
        TB = _round_up(-(-B // 2), align)
        Bp = _round_up(B, TB)
    grid = (Bp // TB,)

    # ---- operands (x: f32, unpadded features; weights: bf16, pre-transposed) ----
    x_in = x if Bp == B else jnp.pad(x, ((0, Bp - B), (0, 0)))
    w1 = _pad2(params["w1"].astype(cd), input_dim, h_p)
    b1 = _pad2(params["b1"].astype(jnp.float32), 1, h_p)
    w2 = _pad2(params["w2"].astype(cd), h_p, h_p)
    b2 = _pad2(params["b2"].astype(jnp.float32), 1, h_p)
    w3 = _pad2(params["w3"].astype(cd), h_p, h2_p)
    b3 = _pad2(params["b3"].astype(jnp.float32), 1, h2_p)
    wh = _pad2(jnp.concatenate([params["wmu"], params["wlv"]], axis=1).astype(cd),
               h2_p, head_p)
    bh = _pad2(jnp.concatenate([params["bmu"], params["blv"]], axis=1).astype(jnp.float32),
               1, head_p)
    operands = (x_in, w1, b1, w2, b2, w3, b3, wh, bh)

    # ---- VMEM budget: resident (single-buffered) weights + double-buffered
    #      x/out blocks + live per-tile f32/bf16 activations ----
    weight_bytes = ((input_dim * h_p + h_p * h_p + h_p * h2_p + h2_p * head_p) * cd.itemsize
                    + (2 * h_p + h2_p + head_p) * 4)
    io_block_bytes = 2 * (TB * input_dim * 4 + TB * head_p * od.itemsize)
    act_bytes = (2 * TB * h_p * (4 + cd.itemsize)      # layers 1-2: f32 GELU + bf16 recast
                 + TB * h2_p * (4 + cd.itemsize)       # layer 3
                 + TB * head_p * 4)                    # fused-head f32 accumulator
    needed = weight_bytes + io_block_bytes + act_bytes
    vmem_limit = int(min(int(0.85 * cap), max(32 * 2**20, int(1.25 * needed))))
    if weight_bytes > int(0.7 * cap):
        # TODO(synk): tiled-N fallback (extra grid axis / emit_pipeline over w2
        # columns, or fp8 w2 on v7x) instead of the weights-fully-resident design.
        raise ValueError(f"resident weights ({weight_bytes} B) exceed the VMEM "
                         f"budget of this chip ({cap} B)")

    # ---- advisory cost estimate: erf GELU is VALU polynomial work (not a
    #      transcendental); resident weights are read from HBM exactly once ----
    flops = 2 * Bp * (input_dim * h_p + h_p * h_p + h_p * h2_p + h2_p * head_p)
    transcendentals = Bp * (2 * h_p + h2_p) if approximate_gelu else 0
    bytes_accessed = Bp * input_dim * 4 + weight_bytes + Bp * head_p * od.itemsize

    def build(weight_mode):
        def wspec(shape):
            if weight_mode is None:
                return pl.BlockSpec(shape, lambda i: (0, 0))
            return pl.BlockSpec(shape, lambda i: (0, 0), pipeline_mode=weight_mode)

        return pl.pallas_call(
            functools.partial(vae_encoder_kernel, approximate_gelu=approximate_gelu),
            out_shape=jax.ShapeDtypeStruct((Bp, head_p), od),
            grid=grid,
            in_specs=[
                pl.BlockSpec((TB, input_dim), lambda i: (i, 0)),   # x: tiled over batch
                wspec((input_dim, h_p)), wspec((1, h_p)),          # weights/biases resident
                wspec((h_p, h_p)), wspec((1, h_p)),
                wspec((h_p, h2_p)), wspec((1, h2_p)),
                wspec((h2_p, head_p)), wspec((1, head_p)),
            ],
            out_specs=pl.BlockSpec((TB, head_p), lambda i: (i, 0)),
            compiler_params=pltpu.CompilerParams(
                dimension_semantics=("parallel",),
                vmem_limit_bytes=vmem_limit,
            ),
            cost_estimate=pl.CostEstimate(
                flops=flops,
                transcendentals=transcendentals,
                bytes_accessed=bytes_accessed,
            ),
        )

    try:
        # Constant-index weights/biases: single VMEM buffer (no double-buffering).
        out = build(pl.Buffered(1))(*operands)
    except Exception:
        # Fallback for JAX versions that reject buffer_count=1.
        out = build(None)(*operands)

    mu = out[:B, :latent_dim].astype(jnp.float32)
    logvar = out[:B, latent_dim:head_dim].astype(jnp.float32)
    return mu, logvar


def init_params(key, input_dim, hidden_dim, latent_dim):
    """Deterministic init mimicking nn.Linear (uniform +-1/sqrt(fan_in)).
    Weights stored as (in, out); biases as (1, out)."""
    dims = [
        ("w1", "b1", input_dim, hidden_dim),
        ("w2", "b2", hidden_dim, hidden_dim),
        ("w3", "b3", hidden_dim, hidden_dim // 2),
        ("wmu", "bmu", hidden_dim // 2, latent_dim),
        ("wlv", "blv", hidden_dim // 2, latent_dim),
    ]
    params = {}
    for wname, bname, fan_in, fan_out in dims:
        key, kw, kb = jax.random.split(key, 3)
        bound = 1.0 / jnp.sqrt(jnp.float32(fan_in))
        params[wname] = jax.random.uniform(kw, (fan_in, fan_out), jnp.float32,
                                           minval=-bound, maxval=bound)
        params[bname] = jax.random.uniform(kb, (1, fan_out), jnp.float32,
                                           minval=-bound, maxval=bound)
    return params


def reference_forward(x, params, *, compute_dtype=jnp.bfloat16, approximate_gelu=False):
    """Pure-JAX reference mirroring the kernel's dtype handling
    (eval-mode dropout = identity)."""
    cd = jnp.dtype(compute_dtype)
    gelu = _gelu_tanh if approximate_gelu else _gelu_exact

    def lin(v, w, b):
        return (jnp.dot(v.astype(cd), w.astype(cd),
                        preferred_element_type=jnp.float32)
                + b.astype(jnp.float32))

    h = gelu(lin(x, params["w1"], params["b1"])).astype(cd)
    h = gelu(lin(h, params["w2"], params["b2"])).astype(cd)
    h = gelu(lin(h, params["w3"], params["b3"])).astype(cd)
    mu = lin(h, params["wmu"], params["bmu"])
    logvar = lin(h, params["wlv"], params["blv"])
    return mu, logvar


if __name__ == "__main__":
    # Small shapes consistent with the module: batch=8, input_dim=16,
    # hidden_dim=32 (so hidden_dim//2=16), latent_dim=8.
    # NOTE: at these toy sizes the kernel is fixed-overhead bound; the layout /
    # tiling / VMEM-budget logic above pays off at realistic widths.
    B, INPUT_DIM, HIDDEN_DIM, LATENT_DIM = 8, 16, 32, 8

    key = jax.random.PRNGKey(0)
    key, kx = jax.random.split(key)
    x = jax.random.normal(kx, (B, INPUT_DIM), jnp.float32)

    params = init_params(key, INPUT_DIM, HIDDEN_DIM, LATENT_DIM)

    mu, logvar = vae_encoder_forward(x, params)
    mu = jax.block_until_ready(mu)
    logvar = jax.block_until_ready(logvar)

    mu_ref, logvar_ref = reference_forward(x, params)
    assert mu.shape == (B, LATENT_DIM) and logvar.shape == (B, LATENT_DIM)
    assert jnp.allclose(mu, mu_ref, atol=1e-3, rtol=1e-3), \
        f"mu mismatch: max abs err {jnp.max(jnp.abs(mu - mu_ref))}"
    assert jnp.allclose(logvar, logvar_ref, atol=1e-3, rtol=1e-3), \
        f"logvar mismatch: max abs err {jnp.max(jnp.abs(logvar - logvar_ref))}"

    print("KERNEL_OK")
</pallas_src>

<mosaic_0001>
module attributes {stable_mosaic.version = 11 : i64} {
  func.func @vae_encoder_kernel(%arg0: i32, %arg1: memref<8x16xf32, #tpu.memory_space<vmem>>, %arg2: memref<16x128xbf16, #tpu.memory_space<vmem>>, %arg3: memref<1x128xf32, #tpu.memory_space<vmem>>, %arg4: memref<128x128xbf16, #tpu.memory_space<vmem>>, %arg5: memref<1x128xf32, #tpu.memory_space<vmem>>, %arg6: memref<128x128xbf16, #tpu.memory_space<vmem>>, %arg7: memref<1x128xf32, #tpu.memory_space<vmem>>, %arg8: memref<128x128xbf16, #tpu.memory_space<vmem>>, %arg9: memref<1x128xf32, #tpu.memory_space<vmem>>, %arg10: memref<8x128xf32, #tpu.memory_space<vmem>>) attributes {dimension_semantics = [#tpu.dimension_semantics<parallel>], iteration_bounds = array<i64: 1>, scalar_prefetch = 0 : i64, scratch_operands = 0 : i64, tpu.core_type = #tpu.core_type<tc>, window_params = [{transform_indices = @transform_0, window_bounds = array<i64: 8, 16>}, {pipeline_mode = #tpu.pipeline_mode<synchronous>, transform_indices = @transform_1, window_bounds = array<i64: 16, 128>}, {pipeline_mode = #tpu.pipeline_mode<synchronous>, transform_indices = @transform_2, window_bounds = array<i64: 1, 128>}, {pipeline_mode = #tpu.pipeline_mode<synchronous>, transform_indices = @transform_3, window_bounds = array<i64: 128, 128>}, {pipeline_mode = #tpu.pipeline_mode<synchronous>, transform_indices = @transform_4, window_bounds = array<i64: 1, 128>}, {pipeline_mode = #tpu.pipeline_mode<synchronous>, transform_indices = @transform_5, window_bounds = array<i64: 128, 128>}, {pipeline_mode = #tpu.pipeline_mode<synchronous>, transform_indices = @transform_6, window_bounds = array<i64: 1, 128>}, {pipeline_mode = #tpu.pipeline_mode<synchronous>, transform_indices = @transform_7, window_bounds = array<i64: 128, 128>}, {pipeline_mode = #tpu.pipeline_mode<synchronous>, transform_indices = @transform_8, window_bounds = array<i64: 1, 128>}, {transform_indices = @transform_9, window_bounds = array<i64: 8, 128>}]} {
    %c0 = arith.constant 0 : index
    %c0_0 = arith.constant 0 : index
    %0 = vector.load %arg1[%c0, %c0_0] : memref<8x16xf32, #tpu.memory_space<vmem>>, vector<8x16xf32>
    %1 = arith.truncf %0 : vector<8x16xf32> to vector<8x16xbf16>
    %c0_1 = arith.constant 0 : index
    %c0_2 = arith.constant 0 : index
    %2 = vector.load %arg2[%c0_1, %c0_2] : memref<16x128xbf16, #tpu.memory_space<vmem>>, vector<16x128xbf16>
    %cst = arith.constant dense<0.000000e+00> : vector<8x128xf32>
    %3 = tpu.matmul %1, %2, %cst {dimension_numbers = #tpu.dot_dimension_numbers<[1], [0], [0], [1], [0, 0, 1, 1], [], []>} : vector<8x16xbf16>, vector<16x128xbf16>, vector<8x128xf32> -> vector<8x128xf32>
    %c0_3 = arith.constant 0 : index
    %c0_4 = arith.constant 0 : index
    %4 = vector.load %arg3[%c0_3, %c0_4] : memref<1x128xf32, #tpu.memory_space<vmem>>, vector<1x128xf32>
    %5 = vector.broadcast %4 : vector<1x128xf32> to vector<8x128xf32>
    %6 = arith.addf %3, %5 : vector<8x128xf32>
    %cst_5 = arith.constant 5.000000e-01 : f32
    %7 = vector.broadcast %cst_5 : f32 to vector<8x128xf32>
    %8 = arith.mulf %7, %6 : vector<8x128xf32>
    %cst_6 = arith.constant 0.707106769 : f32
    %9 = vector.broadcast %cst_6 : f32 to vector<8x128xf32>
    %10 = arith.mulf %6, %9 : vector<8x128xf32>
    %11 = math.erf %10 : vector<8x128xf32>
    %cst_7 = arith.constant 1.000000e+00 : f32
    %12 = vector.broadcast %cst_7 : f32 to vector<8x128xf32>
    %13 = arith.addf %12, %11 : vector<8x128xf32>
    %14 = arith.mulf %8, %13 : vector<8x128xf32>
    %15 = arith.truncf %14 : vector<8x128xf32> to vector<8x128xbf16>
    %c0_8 = arith.constant 0 : index
    %c0_9 = arith.constant 0 : index
    %16 = vector.load %arg4[%c0_8, %c0_9] : memref<128x128xbf16, #tpu.memory_space<vmem>>, vector<128x128xbf16>
    %cst_10 = arith.constant dense<0.000000e+00> : vector<8x128xf32>
    %17 = tpu.matmul %15, %16, %cst_10 {dimension_numbers = #tpu.dot_dimension_numbers<[1], [0], [0], [1], [0, 0, 1, 1], [], []>} : vector<8x128xbf16>, vector<128x128xbf16>, vector<8x128xf32> -> vector<8x128xf32>
    %c0_11 = arith.constant 0 : index
    %c0_12 = arith.constant 0 : index
    %18 = vector.load %arg5[%c0_11, %c0_12] : memref<1x128xf32, #tpu.memory_space<vmem>>, vector<1x128xf32>
    %19 = vector.broadcast %18 : vector<1x128xf32> to vector<8x128xf32>
    %20 = arith.addf %17, %19 : vector<8x128xf32>
    %cst_13 = arith.constant 5.000000e-01 : f32
    %21 = vector.broadcast %cst_13 : f32 to vector<8x128xf32>
    %22 = arith.mulf %21, %20 : vector<8x128xf32>
    %cst_14 = arith.constant 0.707106769 : f32
    %23 = vector.broadcast %cst_14 : f32 to vector<8x128xf32>
    %24 = arith.mulf %20, %23 : vector<8x128xf32>
    %25 = math.erf %24 : vector<8x128xf32>
    %cst_15 = arith.constant 1.000000e+00 : f32
    %26 = vector.broadcast %cst_15 : f32 to vector<8x128xf32>
    %27 = arith.addf %26, %25 : vector<8x128xf32>
    %28 = arith.mulf %22, %27 : vector<8x128xf32>
    %29 = arith.truncf %28 : vector<8x128xf32> to vector<8x128xbf16>
    %c0_16 = arith.constant 0 : index
    %c0_17 = arith.constant 0 : index
    %30 = vector.load %arg6[%c0_16, %c0_17] : memref<128x128xbf16, #tpu.memory_space<vmem>>, vector<128x128xbf16>
    %cst_18 = arith.constant dense<0.000000e+00> : vector<8x128xf32>
    %31 = tpu.matmul %29, %30, %cst_18 {dimension_numbers = #tpu.dot_dimension_numbers<[1], [0], [0], [1], [0, 0, 1, 1], [], []>} : vector<8x128xbf16>, vector<128x128xbf16>, vector<8x128xf32> -> vector<8x128xf32>
    %c0_19 = arith.constant 0 : index
    %c0_20 = arith.constant 0 : index
    %32 = vector.load %arg7[%c0_19, %c0_20] : memref<1x128xf32, #tpu.memory_space<vmem>>, vector<1x128xf32>
    %33 = vector.broadcast %32 : vector<1x128xf32> to vector<8x128xf32>
    %34 = arith.addf %31, %33 : vector<8x128xf32>
    %cst_21 = arith.constant 5.000000e-01 : f32
    %35 = vector.broadcast %cst_21 : f32 to vector<8x128xf32>
    %36 = arith.mulf %35, %34 : vector<8x128xf32>
    %cst_22 = arith.constant 0.707106769 : f32
    %37 = vector.broadcast %cst_22 : f32 to vector<8x128xf32>
    %38 = arith.mulf %34, %37 : vector<8x128xf32>
    %39 = math.erf %38 : vector<8x128xf32>
    %cst_23 = arith.constant 1.000000e+00 : f32
    %40 = vector.broadcast %cst_23 : f32 to vector<8x128xf32>
    %41 = arith.addf %40, %39 : vector<8x128xf32>
    %42 = arith.mulf %36, %41 : vector<8x128xf32>
    %43 = arith.truncf %42 : vector<8x128xf32> to vector<8x128xbf16>
    %c0_24 = arith.constant 0 : index
    %c0_25 = arith.constant 0 : index
    %44 = vector.load %arg8[%c0_24, %c0_25] : memref<128x128xbf16, #tpu.memory_space<vmem>>, vector<128x128xbf16>
    %cst_26 = arith.constant dense<0.000000e+00> : vector<8x128xf32>
    %45 = tpu.matmul %43, %44, %cst_26 {dimension_numbers = #tpu.dot_dimension_numbers<[1], [0], [0], [1], [0, 0, 1, 1], [], []>} : vector<8x128xbf16>, vector<128x128xbf16>, vector<8x128xf32> -> vector<8x128xf32>
    %c0_27 = arith.constant 0 : index
    %c0_28 = arith.constant 0 : index
    %46 = vector.load %arg9[%c0_27, %c0_28] : memref<1x128xf32, #tpu.memory_space<vmem>>, vector<1x128xf32>
    %47 = vector.broadcast %46 : vector<1x128xf32> to vector<8x128xf32>
    %48 = arith.addf %45, %47 : vector<8x128xf32>
    %c0_29 = arith.constant 0 : index
    %c0_30 = arith.constant 0 : index
    %49 = vector.load %arg10[%c0_29, %c0_30] : memref<8x128xf32, #tpu.memory_space<vmem>>, vector<8x128xf32>
    tpu.vector_store %arg10[%c0_29, %c0_30], %48 {strides = array<i32>} : memref<8x128xf32, #tpu.memory_space<vmem>>, vector<8x128xf32>,
    return
  }
  func.func @transform_0(%arg0: i32) -> (i32, i32) {
    %c0_i32 = arith.constant 0 : i32
    %c0_i32_0 = arith.constant 0 : i32
    return %arg0, %c0_i32 : i32, i32
  }
  func.func @transform_1(%arg0: i32) -> (i32, i32) {
    %c0_i32 = arith.constant 0 : i32
    %c0_i32_0 = arith.constant 0 : i32
    %c0_i32_1 = arith.constant 0 : i32
    return %c0_i32, %c0_i32_0 : i32, i32
  }
  func.func @transform_2(%arg0: i32) -> (i32, i32) {
    %c0_i32 = arith.constant 0 : i32
    %c0_i32_0 = arith.constant 0 : i32
    %c0_i32_1 = arith.constant 0 : i32
    return %c0_i32, %c0_i32_0 : i32, i32
  }
  func.func @transform_3(%arg0: i32) -> (i32, i32) {
    %c0_i32 = arith.constant 0 : i32
    %c0_i32_0 = arith.constant 0 : i32
    %c0_i32_1 = arith.constant 0 : i32
    return %c0_i32, %c0_i32_0 : i32, i32
  }
  func.func @transform_4(%arg0: i32) -> (i32, i32) {
    %c0_i32 = arith.constant 0 : i32
    %c0_i32_0 = arith.constant 0 : i32
    %c0_i32_1 = arith.constant 0 : i32
    return %c0_i32, %c0_i32_0 : i32, i32
  }
  func.func @transform_5(%arg0: i32) -> (i32, i32) {
    %c0_i32 = arith.constant 0 : i32
    %c0_i32_0 = arith.constant 0 : i32
    %c0_i32_1 = arith.constant 0 : i32
    return %c0_i32, %c0_i32_0 : i32, i32
  }
  func.func @transform_6(%arg0: i32) -> (i32, i32) {
    %c0_i32 = arith.constant 0 : i32
    %c0_i32_0 = arith.constant 0 : i32
    %c0_i32_1 = arith.constant 0 : i32
    return %c0_i32, %c0_i32_0 : i32, i32
  }
  func.func @transform_7(%arg0: i32) -> (i32, i32) {
    %c0_i32 = arith.constant 0 : i32
    %c0_i32_0 = arith.constant 0 : i32
    %c0_i32_1 = arith.constant 0 : i32
    return %c0_i32, %c0_i32_0 : i32, i32
  }
  func.func @transform_8(%arg0: i32) -> (i32, i32) {
    %c0_i32 = arith.constant 0 : i32
    %c0_i32_0 = arith.constant 0 : i32
    %c0_i32_1 = arith.constant 0 : i32
    return %c0_i32, %c0_i32_0 : i32, i32
  }
  func.func @transform_9(%arg0: i32) -> (i32, i32) {
    %c0_i32 = arith.constant 0 : i32
    %c0_i32_0 = arith.constant 0 : i32
    return %arg0, %c0_i32 : i32, i32
  }
}

module attributes {stable_mosaic.version = 11 : i64} {
  func.func @vae_encoder_kernel(%arg0: i32, %arg1: memref<8x16xf32, #tpu.memory_space<vmem>>, %arg2: memref<16x128xbf16, #tpu.memory_space<vmem>>, %arg3: memref<1x128xf32, #tpu.memory_space<vmem>>, %arg4: memref<128x128xbf16, #tpu.memory_space<vmem>>, %arg5: memref<1x128xf32, #tpu.memory_space<vmem>>, %arg6: memref<128x128xbf16, #tpu.memory_space<vmem>>, %arg7: memref<1x128xf32, #tpu.memory_space<vmem>>, %arg8: memref<128x128xbf16, #tpu.memory_space<vmem>>, %arg9: memref<1x128xf32, #tpu.memory_space<vmem>>, %arg10: memref<8x128xf32, #tpu.memory_space<vmem>>) attributes {dimension_semantics = [#tpu.dimension_semantics<parallel>], iteration_bounds = array<i64: 1>, scalar_prefetch = 0 : i64, scratch_operands = 0 : i64, tpu.core_type = #tpu.core_type<tc>, window_params = [{transform_indices = @transform_0, window_bounds = array<i64: 8, 16>}, {pipeline_mode = #tpu.pipeline_mode<synchronous>, transform_indices = @transform_1, window_bounds = array<i64: 16, 128>}, {pipeline_mode = #tpu.pipeline_mode<synchronous>, transform_indices = @transform_2, window_bounds = array<i64: 1, 128>}, {pipeline_mode = #tpu.pipeline_mode<synchronous>, transform_indices = @transform_3, window_bounds = array<i64: 128, 128>}, {pipeline_mode = #tpu.pipeline_mode<synchronous>, transform_indices = @transform_4, window_bounds = array<i64: 1, 128>}, {pipeline_mode = #tpu.pipeline_mode<synchronous>, transform_indices = @transform_5, window_bounds = array<i64: 128, 128>}, {pipeline_mode = #tpu.pipeline_mode<synchronous>, transform_indices = @transform_6, window_bounds = array<i64: 1, 128>}, {pipeline_mode = #tpu.pipeline_mode<synchronous>, transform_indices = @transform_7, window_bounds = array<i64: 128, 128>}, {pipeline_mode = #tpu.pipeline_mode<synchronous>, transform_indices = @transform_8, window_bounds = array<i64: 1, 128>}, {transform_indices = @transform_9, window_bounds = array<i64: 8, 128>}]} {
    %c0 = arith.constant 0 : index
    %c0_0 = arith.constant 0 : index
    %0 = vector.load %arg1[%c0, %c0_0] : memref<8x16xf32, #tpu.memory_space<vmem>>, vector<8x16xf32>
    %1 = arith.truncf %0 : vector<8x16xf32> to vector<8x16xbf16>
    %c0_1 = arith.constant 0 : index
    %c0_2 = arith.constant 0 : index
    %2 = vector.load %arg2[%c0_1, %c0_2] : memref<16x128xbf16, #tpu.memory_space<vmem>>, vector<16x128xbf16>
    %cst = arith.constant dense<0.000000e+00> : vector<8x128xf32>
    %3 = tpu.matmul %1, %2, %cst {dimension_numbers = #tpu.dot_dimension_numbers<[1], [0], [0], [1], [0, 0, 1, 1], [], []>} : vector<8x16xbf16>, vector<16x128xbf16>, vector<8x128xf32> -> vector<8x128xf32>
    %c0_3 = arith.constant 0 : index
    %c0_4 = arith.constant 0 : index
    %4 = vector.load %arg3[%c0_3, %c0_4] : memref<1x128xf32, #tpu.memory_space<vmem>>, vector<1x128xf32>
    %5 = vector.broadcast %4 : vector<1x128xf32> to vector<8x128xf32>
    %6 = arith.addf %3, %5 : vector<8x128xf32>
    %cst_5 = arith.constant 5.000000e-01 : f32
    %7 = vector.broadcast %cst_5 : f32 to vector<8x128xf32>
    %8 = arith.mulf %7, %6 : vector<8x128xf32>
    %cst_6 = arith.constant 0.707106769 : f32
    %9 = vector.broadcast %cst_6 : f32 to vector<8x128xf32>
    %10 = arith.mulf %6, %9 : vector<8x128xf32>
    %11 = math.erf %10 : vector<8x128xf32>
    %cst_7 = arith.constant 1.000000e+00 : f32
    %12 = vector.broadcast %cst_7 : f32 to vector<8x128xf32>
    %13 = arith.addf %12, %11 : vector<8x128xf32>
    %14 = arith.mulf %8, %13 : vector<8x128xf32>
    %15 = arith.truncf %14 : vector<8x128xf32> to vector<8x128xbf16>
    %c0_8 = arith.constant 0 : index
    %c0_9 = arith.constant 0 : index
    %16 = vector.load %arg4[%c0_8, %c0_9] : memref<128x128xbf16, #tpu.memory_space<vmem>>, vector<128x128xbf16>
    %cst_10 = arith.constant dense<0.000000e+00> : vector<8x128xf32>
    %17 = tpu.matmul %15, %16, %cst_10 {dimension_numbers = #tpu.dot_dimension_numbers<[1], [0], [0], [1], [0, 0, 1, 1], [], []>} : vector<8x128xbf16>, vector<128x128xbf16>, vector<8x128xf32> -> vector<8x128xf32>
    %c0_11 = arith.constant 0 : index
    %c0_12 = arith.constant 0 : index
    %18 = vector.load %arg5[%c0_11, %c0_12] : memref<1x128xf32, #tpu.memory_space<vmem>>, vector<1x128xf32>
    %19 = vector.broadcast %18 : vector<1x128xf32> to vector<8x128xf32>
    %20 = arith.addf %17, %19 : vector<8x128xf32>
    %cst_13 = arith.constant 5.000000e-01 : f32
    %21 = vector.broadcast %cst_13 : f32 to vector<8x128xf32>
    %22 = arith.mulf %21, %20 : vector<8x128xf32>
    %cst_14 = arith.constant 0.707106769 : f32
    %23 = vector.broadcast %cst_14 : f32 to vector<8x128xf32>
    %24 = arith.mulf %20, %23 : vector<8x128xf32>
    %25 = math.erf %24 : vector<8x128xf32>
    %cst_15 = arith.constant 1.000000e+00 : f32
    %26 = vector.broadcast %cst_15 : f32 to vector<8x128xf32>
    %27 = arith.addf %26, %25 : vector<8x128xf32>
    %28 = arith.mulf %22, %27 : vector<8x128xf32>
    %29 = arith.truncf %28 : vector<8x128xf32> to vector<8x128xbf16>
    %c0_16 = arith.constant 0 : index
    %c0_17 = arith.constant 0 : index
    %30 = vector.load %arg6[%c0_16, %c0_17] : memref<128x128xbf16, #tpu.memory_space<vmem>>, vector<128x128xbf16>
    %cst_18 = arith.constant dense<0.000000e+00> : vector<8x128xf32>
    %31 = tpu.matmul %29, %30, %cst_18 {dimension_numbers = #tpu.dot_dimension_numbers<[1], [0], [0], [1], [0, 0, 1, 1], [], []>} : vector<8x128xbf16>, vector<128x128xbf16>, vector<8x128xf32> -> vector<8x128xf32>
    %c0_19 = arith.constant 0 : index
    %c0_20 = arith.constant 0 : index
    %32 = vector.load %arg7[%c0_19, %c0_20] : memref<1x128xf32, #tpu.memory_space<vmem>>, vector<1x128xf32>
    %33 = vector.broadcast %32 : vector<1x128xf32> to vector<8x128xf32>
    %34 = arith.addf %31, %33 : vector<8x128xf32>
    %cst_21 = arith.constant 5.000000e-01 : f32
    %35 = vector.broadcast %cst_21 : f32 to vector<8x128xf32>
    %36 = arith.mulf %35, %34 : vector<8x128xf32>
    %cst_22 = arith.constant 0.707106769 : f32
    %37 = vector.broadcast %cst_22 : f32 to vector<8x128xf32>
    %38 = arith.mulf %34, %37 : vector<8x128xf32>
    %39 = math.erf %38 : vector<8x128xf32>
    %cst_23 = arith.constant 1.000000e+00 : f32
    %40 = vector.broadcast %cst_23 : f32 to vector<8x128xf32>
    %41 = arith.addf %40, %39 : vector<8x128xf32>
    %42 = arith.mulf %36, %41 : vector<8x128xf32>
    %43 = arith.truncf %42 : vector<8x128xf32> to vector<8x128xbf16>
    %c0_24 = arith.constant 0 : index
    %c0_25 = arith.constant 0 : index
    %44 = vector.load %arg8[%c0_24, %c0_25] : memref<128x128xbf16, #tpu.memory_space<vmem>>, vector<128x128xbf16>
    %cst_26 = arith.constant dense<0.000000e+00> : vector<8x128xf32>
    %45 = tpu.matmul %43, %44, %cst_26 {dimension_numbers = #tpu.dot_dimension_numbers<[1], [0], [0], [1], [0, 0, 1, 1], [], []>} : vector<8x128xbf16>, vector<128x128xbf16>, vector<8x128xf32> -> vector<8x128xf32>
    %c0_27 = arith.constant 0 : index
    %c0_28 = arith.constant 0 : index
    %46 = vector.load %arg9[%c0_27, %c0_28] : memref<1x128xf32, #tpu.memory_space<vmem>>, vector<1x128xf32>
    %47 = vector.broadcast %46 : vector<1x128xf32> to vector<8x128xf32>
    %48 = arith.addf %45, %47 : vector<8x128xf32>
    %c0_29 = arith.constant 0 : index
    %c0_30 = arith.constant 0 : index
    %49 = vector.load %arg10[%c0_29, %c0_30] : memref<8x128xf32, #tpu.memory_space<vmem>>, vector<8x128xf32>
    tpu.vector_store %arg10[%c0_29, %c0_30], %48 {strides = array<i32>} : memref<8x128xf32, #tpu.memory_space<vmem>>, vector<8x128xf32>,
    return
  }
  func.func @transform_0(%arg0: i32) -> (i32, i32) {
    %c0_i32 = arith.constant 0 : i32
    %c0_i32_0 = arith.constant 0 : i32
    return %arg0, %c0_i32 : i32, i32
  }
  func.func @transform_1(%arg0: i32) -> (i32, i32) {
    %c0_i32 = arith.constant 0 : i32
    %c0_i32_0 = arith.constant 0 : i32
    %c0_i32_1 = arith.constant 0 : i32
    return %c0_i32, %c0_i32_0 : i32, i32
  }
  func.func @transform_2(%arg0: i32) -> (i32, i32) {
    %c0_i32 = arith.constant 0 : i32
    %c0_i32_0 = arith.constant 0 : i32
    %c0_i32_1 = arith.constant 0 : i32
    return %c0_i32, %c0_i32_0 : i32, i32
  }
  func.func @transform_3(%arg0: i32) -> (i32, i32) {
    %c0_i32 = arith.constant 0 : i32
    %c0_i32_0 = arith.constant 0 : i32
    %c0_i32_1 = arith.constant 0 : i32
    return %c0_i32, %c0_i32_0 : i32, i32
  }
  func.func @transform_4(%arg0: i32) -> (i32, i32) {
    %c0_i32 = arith.constant 0 : i32
    %c0_i32_0 = arith.constant 0 : i32
    %c0_i32_1 = arith.constant 0 : i32
    return %c0_i32, %c0_i32_0 : i32, i32
  }
  func.func @transform_5(%arg0: i32) -> (i32, i32) {
    %c0_i32 = arith.constant 0 : i32
    %c0_i32_0 = arith.constant 0 : i32
    %c0_i32_1 = arith.constant 0 : i32
    return %c0_i32, %c0_i32_0 : i32, i32
  }
  func.func @transform_6(%arg0: i32) -> (i32, i32) {
    %c0_i32 = arith.constant 0 : i32
    %c0_i32_0 = arith.constant 0 : i32
    %c0_i32_1 = arith.constant 0 : i32
    return %c0_i32, %c0_i32_0 : i32, i32
  }
  func.func @transform_7(%arg0: i32) -> (i32, i32) {
    %c0_i32 = arith.constant 0 : i32
    %c0_i32_0 = arith.constant 0 : i32
    %c0_i32_1 = arith.constant 0 : i32
    return %c0_i32, %c0_i32_0 : i32, i32
  }
  func.func @transform_8(%arg0: i32) -> (i32, i32) {
    %c0_i32 = arith.constant 0 : i32
    %c0_i32_0 = arith.constant 0 : i32
    %c0_i32_1 = arith.constant 0 : i32
    return %c0_i32, %c0_i32_0 : i32, i32
  }
  func.func @transform_9(%arg0: i32) -> (i32, i32) {
    %c0_i32 = arith.constant 0 : i32
    %c0_i32_0 = arith.constant 0 : i32
    return %arg0, %c0_i32 : i32, i32
  }
}

</mosaic_0001>

<bundles_post_ra>
// kernel: tpu_custom_call.1
= control target key start
LH: loop header
LB: loop body
LE: loop exit
PB: predicated region body
PF: predicated region fallthrough
CT: control target
= control target key end

     0   :  { %14 = vsyncpa [#allocation3], 0  ;;  %s1025_s0 = inlined_call_operand.hbm [shape: f32[8,16], index: 0, kind: input, shape index: {}]   ;;  %s1026_s1 = inlined_call_operand.hbm [shape: bf16[16,128], index: 1, kind: input, shape index: {}]   ;;  %s1027_s2 = inlined_call_operand.vmem [shape: f32[1,128], index: 2, kind: input, shape index: {}]   ;;  %s1028_s3 = inlined_call_operand.hbm [shape: bf16[128,128], index: 3, kind: input, shape index: {}]   ;;  %s1029_s4 = inlined_call_operand.vmem [shape: f32[1,128], index: 4, kind: input, shape index: {}]   ;;  %s1030_s5 = inlined_call_operand.hbm [shape: bf16[128,128], index: 5, kind: input, shape index: {}]   ;;  %s1031_s6 = inlined_call_operand.vmem [shape: f32[1,128], index: 6, kind: input, shape index: {}]   ;;  %s1032_s7 = inlined_call_operand.hbm [shape: bf16[128,128], index: 7, kind: input, shape index: {}]   ;;  %s1033_s8 = inlined_call_operand.vmem [shape: f32[1,128], index: 8, kind: input, shape index: {}]   ;;  %s1034_s9 = inlined_call_operand.hbm [shape: f32[8,128], index: 9, kind: output, shape index: {}]  }
   0x1   :  { %15 = vsyncpa [#allocation6], 0 }
   0x2   :  { %16 = vsyncpa [#allocation9], 0 }
   0x3   :  { %17 = vsyncpa [#allocation4], 0  ;;  %s836_s30 = smov [#allocation5]   ;;  %s696_s13 = scalar_lea.hbm %s1026_s1, 128 }
   0x4   :  { %s33_s10 = sshll.u32 %s836_s30, 4  ;;  %p697_p0 = scmp.ne.s32.totalorder %s1026_s1, %s696_s13  ;;  %s34_s10 = int_to_ptr.vmem [resolvable:$true] %s33_s10 }
   0x5   :  { %p700_p1 = scmp.lt.u32.totalorder %s696_s13, %s1026_s1 }
   0x7   :  { %p702_p2 = pnand %p700_p1, %p697_p0 }
   0x9   :  { %705 = shalt.err (!%p702_p2)
}
   0xa   :  { %s706_s18 = scalar_lea.vmem %s34_s10, 128  ;;  %p711_p4 = scmp.lt.s32.totalorder %s34_s10, %s34_s10 }
   0xb   :  { %p707_p3 = scmp.ne.s32.totalorder %s34_s10, %s706_s18  ;;  %p712_p5 = scmp.lt.s32.totalorder %s706_s18, %s706_s18 }
   0xd   :  { %p713_p6 = por %p712_p5, %p711_p4 }
   0xf   :  { %p714_p7 = pnand %p713_p6, %p707_p3 }
  0x11   :  { %717 = shalt.err (!%p714_p7)
}
  0x12   :  { %s837_s19 = smov 64   ;;  %s838_s20 = smov 4  }
  0x13   :  { %39 = dma.hbm_to_vmem [thread:$0]  %s1026_s1, 128, %s34_s10, [#allocation6], %s837_s19, %s837_s19, %s838_s20  }
  0x14   :  { %s839_s23 = smov [#allocation8]   ;;  %s840_s25 = smov [#allocation2]  }
  0x15   :  { %s61_s24 = sshll.u32 %s839_s23, 4  ;;  %s24_s26 = sshll.u32 %s840_s25, 4  ;;  %s62_s24 = int_to_ptr.vmem [resolvable:$true] %s61_s24  ;;  %s25_s26 = int_to_ptr.vmem [resolvable:$true] %s24_s26 }
  0x16   :  { %s718_s29 = scalar_lea.hbm %s1030_s5, 1024 }
  0x17   :  { %p719_p8 = scmp.ne.s32.totalorder %s1030_s5, %s718_s29  ;;  %p722_p9 = scmp.lt.u32.totalorder %s718_s29, %s1030_s5 }
  0x19   :  { %p724_p10 = pnand %p722_p9, %p719_p8 }
  0x1b   :  { %727 = shalt.err (!%p724_p10)
}
  0x1c   :  { %s728_s1 = scalar_lea.vmem %s62_s24, 1024  ;;  %p733_p12 = scmp.lt.s32.totalorder %s62_s24, %s62_s24 }
  0x1d   :  { %p729_p11 = scmp.ne.s32.totalorder %s62_s24, %s728_s1  ;;  %p734_p13 = scmp.lt.s32.totalorder %s728_s1, %s728_s1 }
  0x1f   :  { %p735_p0 = por %p734_p13, %p733_p12 }
  0x21   :  { %p736_p1 = pnand %p735_p0, %p729_p11 }
  0x23   :  { %739 = shalt.err (!%p736_p1)
}
  0x24   :  { %67 = dma.hbm_to_vmem [thread:$0]  %s1030_s5, 1024, %s62_s24, [#allocation9], %s837_s19, %s837_s19, %s838_s20  }
  0x25   :  { %s740_s17 = scalar_lea.hbm %s1025_s0, 128 }
  0x26   :  { %p741_p2 = scmp.ne.s32.totalorder %s1025_s0, %s740_s17  ;;  %p744_p3 = scmp.lt.u32.totalorder %s740_s17, %s1025_s0 }
  0x28   :  { %p746_p4 = pnand %p744_p3, %p741_p2 }
  0x2a   :  { %749 = shalt.err (!%p746_p4)
}
  0x2b   :  { %s750_s25 = scalar_lea.vmem %s25_s26, 128  ;;  %p755_p6 = scmp.lt.s32.totalorder %s25_s26, %s25_s26 }
  0x2c   :  { %p751_p5 = scmp.ne.s32.totalorder %s25_s26, %s750_s25  ;;  %p756_p7 = scmp.lt.s32.totalorder %s750_s25, %s750_s25 }
  0x2e   :  { %p757_p8 = por %p756_p7, %p755_p6 }
  0x30   :  { %p758_p9 = pnand %p757_p8, %p751_p5 }
  0x32   :  { %761 = shalt.err (!%p758_p9)
}
  0x33   :  { %27 = dma.hbm_to_vmem [thread:$0]  %s1025_s0, 128, %s25_s26, [#allocation3]  }
  0x34   :  { %s841_s27 = smov [#allocation7]   ;;  %s842_s29 = smov [#allocation10]  }
  0x35   :  { %s47_s28 = sshll.u32 %s841_s27, 4  ;;  %s75_s30 = sshll.u32 %s842_s29, 4  ;;  %s48_s28 = int_to_ptr.vmem [resolvable:$true] %s47_s28  ;;  %s76_s30 = int_to_ptr.vmem [resolvable:$true] %s75_s30 }
  0x36   :  { %s762_s13 = scalar_lea.hbm %s1028_s3, 1024 }
  0x37   :  { %p763_p10 = scmp.ne.s32.totalorder %s1028_s3, %s762_s13  ;;  %p766_p11 = scmp.lt.u32.totalorder %s762_s13, %s1028_s3 }
  0x39   :  { %p768_p12 = pnand %p766_p11, %p763_p10 }
  0x3b   :  { %771 = shalt.err (!%p768_p12)
}
  0x3c   :  { %s772_s0 = scalar_lea.vmem %s48_s28, 1024  ;;  %p777_p0 = scmp.lt.s32.totalorder %s48_s28, %s48_s28 }
  0x3d   :  { %p773_p13 = scmp.ne.s32.totalorder %s48_s28, %s772_s0  ;;  %p778_p1 = scmp.lt.s32.totalorder %s772_s0, %s772_s0 }
  0x3f   :  { %p779_p2 = por %p778_p1, %p777_p0 }
  0x41   :  { %p780_p3 = pnand %p779_p2, %p773_p13 }
  0x43   :  { %783 = shalt.err (!%p780_p3)
}
  0x44   :  { %53 = dma.hbm_to_vmem [thread:$0]  %s1028_s3, 1024, %s48_s28, [#allocation6], %s837_s19, %s837_s19, %s838_s20  }
  0x45   :  { %s784_s21 = scalar_lea.hbm %s1032_s7, 1024 }
  0x46   :  { %p785_p4 = scmp.ne.s32.totalorder %s1032_s7, %s784_s21  ;;  %p788_p5 = scmp.lt.u32.totalorder %s784_s21, %s1032_s7 }
  0x48   :  { %p790_p6 = pnand %p788_p5, %p785_p4 }
  0x4a   :  { %793 = shalt.err (!%p790_p6)
}
  0x4b   :  { %s794_s24 = scalar_lea.vmem %s76_s30, 1024  ;;  %p799_p8 = scmp.lt.s32.totalorder %s76_s30, %s76_s30 }
  0x4c   :  { %p795_p7 = scmp.ne.s32.totalorder %s76_s30, %s794_s24  ;;  %p800_p9 = scmp.lt.s32.totalorder %s794_s24, %s794_s24 }
  0x4e   :  { %p801_p10 = por %p800_p9, %p799_p8 }
  0x50   :  { %p802_p11 = pnand %p801_p10, %p795_p7 }
  0x52   :  { %805 = shalt.err (!%p802_p11)
}
  0x53   :  { %81 = dma.hbm_to_vmem [thread:$0]  %s1032_s7, 1024, %s76_s30, [#allocation9], %s837_s19, %s837_s19, %s838_s20  }
  0x54   :  { %828 = dma.done.wait [#allocation3], 128  }
  0x55   :  { %829 = vsyncadd [#allocation3], 4294967168 }
  0x56   :  { %830 = dma.done.wait [#allocation6], 1152  }
  0x57   :  { %831 = vsyncadd [#allocation6], 4294966144 }
  0x58   :  { %832 = dma.done.wait [#allocation9], 2048  }
  0x59   :  { %833 = vsyncadd [#allocation9], 4294965248  ;;  %v843_v0 = vmov 0.0   ;;  %vm844_vm0 = vmmov 0   ;;  %v665_v1 = vld [vmem:[#allocation5] sm:$0xff]   ;;  %v100_v2 = vld [vmem:[#allocation2] sm:$0xff] }
  0x5a   :  { %589 = vmatprep.subr.bf16.mxu0 %v843_v0  ;;  %591 = vmatprep.mubr.msk.bf16.mxu0 %vm844_vm0, %v843_v0  ;;  %v101_v3 = vpack.c.bf16 %v100_v2, %v100_v2  ;;  %vm117_vm1 = vcmask 130048   ;;  %v666_v4 = vld [vmem:[#allocation7] sm:$0xff]   ;;  %v667_v5 = vld [vmem:[#allocation7 + $0x8] sm:$0xff]   ;;  %v668_v6 = vld [vmem:[#allocation7 + $0x10] sm:$0xff]   ;;  %s845_s11 = smov [#allocation11]  }
  0x5b   :  { %595 = vmatprep.subr.bf16.mxu1 %v843_v0  ;;  %611 = vmatprep.mubr.msk.bf16.mxu1 %vm844_vm0, %v843_v0  ;;  %v669_v7 = vld [vmem:[#allocation7 + $0x18] sm:$0xff]   ;;  %v670_v8 = vld [vmem:[#allocation7 + $0x20] sm:$0xff]   ;;  %v671_v9 = vld [vmem:[#allocation7 + $0x28] sm:$0xff]   ;;  %s519_s12 = sshll.u32 %s845_s11, 4  ;;  %s520_s12 = int_to_ptr.vmem [resolvable:$true] %s519_s12 }
  0x5c   :  { %590 = vmatpush3.bf16.msra.mxu0 %v665_v1  ;;  %596 = vmatpush3.bf16.msra.mxu1 %v666_v4  ;;  %v672_v10 = vld [vmem:[#allocation7 + $0x30] sm:$0xff]   ;;  %v673_v11 = vld [vmem:[#allocation7 + $0x38] sm:$0xff]   ;;  %v674_v12 = vld [vmem:[#allocation8] sm:$0xff]   ;;  %p811_p13 = scmp.lt.s32.totalorder %s520_s12, %s520_s12 }
  0x5d   :  { %615 = vmatprep.subr.bf16.mxu0 %v843_v0  ;;  %597 = vmatprep.subr.bf16.mxu1 %v843_v0  ;;  %v675_v13 = vld [vmem:[#allocation8 + $0x8] sm:$0xff]   ;;  %v676_v14 = vld [vmem:[#allocation8 + $0x10] sm:$0xff]   ;;  %v677_v27 = vld [vmem:[#allocation8 + $0x18] sm:$0xff]  }
  0x5e   :  { %v530_v15 = vld [vmem:[%s1027_s2] ss:$0 sm:$0xff]  ;;  %v678_v28 = vld [vmem:[#allocation8 + $0x20] sm:$0xff]   ;;  %v679_v29 = vld [vmem:[#allocation8 + $0x28] sm:$0xff]  }
  0x5f   :  { %592 = vmatmul.mubr.msk.bf16.vlgmr.msra.gmra.mrb[0].mxu0 %vm117_vm1, %v101_v3  ;;  %v680_v30 = vld [vmem:[#allocation8 + $0x30] sm:$0xff]   ;;  %v681_v31 = vld [vmem:[#allocation8 + $0x38] sm:$0xff]   ;;  %v682_v32 = vld [vmem:[#allocation10] sm:$0xff]  }
  0x60   :  { %631 = vmatprep.mubr.msk.bf16.mxu0 %vm844_vm0, %v843_v0  ;;  %598 = vmatpush3.bf16.msra.mxu1 %v667_v5  ;;  %v683_v33 = vld [vmem:[#allocation10 + $0x8] sm:$0xff]   ;;  %v684_v34 = vld [vmem:[#allocation10 + $0x10] sm:$0xff]   ;;  %v685_v47 = vld [vmem:[#allocation10 + $0x18] sm:$0xff]  }
  0x61   :  { %599 = vmatprep.subr.bf16.mxu1 %v843_v0  ;;  %616 = vmatpush3.bf16.msra.mxu0 %v674_v12  ;;  %v533_v35 = vld [vmem:[%s1029_s4] ss:$0 sm:$0xff]  ;;  %v686_v48 = vld [vmem:[#allocation10 + $0x20] sm:$0xff]   ;;  %v687_v49 = vld [vmem:[#allocation10 + $0x28] sm:$0xff]  }
  0x62   :  { %617 = vmatprep.subr.bf16.mxu0 %v843_v0  ;;  %v688_v50 = vld [vmem:[#allocation10 + $0x30] sm:$0xff]   ;;  %v689_v51 = vld [vmem:[#allocation10 + $0x38] sm:$0xff]  }
  0x63   :  { %v542_v52 = vld [vmem:[%s1031_s6] ss:$0 sm:$0xff]  ;;  %s806_s6 = scalar_lea.vmem %s520_s12, 128 }
  0x64   :  { %600 = vmatpush3.bf16.msra.mxu1 %v668_v6  ;;  %p807_p12 = scmp.ne.s32.totalorder %s520_s12, %s806_s6  ;;  %p812_p0 = scmp.lt.s32.totalorder %s806_s6, %s806_s6 }
  0x65   :  { %601 = vmatprep.subr.bf16.mxu1 %v843_v0  ;;  %618 = vmatpush3.bf16.msra.mxu0 %v675_v13 }
  0x66   :  { %619 = vmatprep.subr.bf16.mxu0 %v843_v0  ;;  %p813_p1 = por %p812_p0, %p811_p13 }
  0x68   :  { %602 = vmatpush3.bf16.msra.mxu1 %v669_v7  ;;  %p814_p2 = pnand %p813_p1, %p807_p12 }
  0x69   :  { %603 = vmatprep.subr.bf16.mxu1 %v843_v0  ;;  %620 = vmatpush3.bf16.msra.mxu0 %v676_v14 }
  0x6a   :  { %621 = vmatprep.subr.bf16.mxu0 %v843_v0 }
  0x6c   :  { %604 = vmatpush3.bf16.msra.mxu1 %v670_v8 }
  0x6d   :  { %605 = vmatprep.subr.bf16.mxu1 %v843_v0  ;;  %622 = vmatpush3.bf16.msra.mxu0 %v677_v27 }
  0x6e   :  { %623 = vmatprep.subr.bf16.mxu0 %v843_v0 }
  0x70   :  { %606 = vmatpush3.bf16.msra.mxu1 %v671_v9 }
  0x71   :  { %607 = vmatprep.subr.bf16.mxu1 %v843_v0  ;;  %624 = vmatpush3.bf16.msra.mxu0 %v678_v28 }
  0x72   :  { %625 = vmatprep.subr.bf16.mxu0 %v843_v0 }
  0x74   :  { %608 = vmatpush3.bf16.msra.mxu1 %v672_v10 }
  0x75   :  { %609 = vmatprep.subr.bf16.mxu1 %v843_v0  ;;  %626 = vmatpush3.bf16.msra.mxu0 %v679_v29 }
  0x76   :  { %627 = vmatprep.subr.bf16.mxu0 %v843_v0 }
  0x78   :  { %610 = vmatpush3.bf16.msra.mxu1 %v673_v11 }
  0x79   :  { %635 = vmatprep.subr.bf16.mxu1 %v843_v0  ;;  %628 = vmatpush3.bf16.msra.mxu0 %v680_v30 }
  0x7a   :  { %629 = vmatprep.subr.bf16.mxu0 %v843_v0 }
  0x7d   :  { %630 = vmatpush3.bf16.msra.mxu0 %v681_v31 }
 0x132   :  { %v155_v16 = vpop.f32.mrb[0].mxu0 }
 0x133   :  { %v156_v17 = vadd.f32 %v530_v15, %v155_v16  ;;  %v593_v18 = vpop.f32.mrb[1].mxu0 }
 0x134   :  { %v158_v19 = vpop.f32.mrb[2].mxu0 }
 0x135   :  { %v162_v20 = vmul.f32 0.70710677, %v156_v17  ;;  %v594_v21 = vpop.f32.mrb[3].mxu0  ;;  %v161_v23 = vmul.f32 0.5, %v156_v17 }
 0x137   :  { %690 = verf.f32 %v162_v20 }
 0x141   :  { %v691_v22 = vpop.eup %690 }
 0x142   :  { %v164_v24 = vadd.f32 1.0, %v691_v22 }
 0x144   :  { %v165_v25 = vmul.f32 %v164_v24, %v161_v23 }
 0x146   :  { %v166_v26 = vpack.c.bf16 %v165_v25, %v165_v25 }
 0x148   :  { %612 = vmatmul.mubr.bf16.vlgmr.msra.gmra.mrb[0].mxu1 %v166_v26 }
 0x149   :  { %651 = vmatprep.mubr.msk.bf16.mxu1 %vm844_vm0, %v843_v0  ;;  %636 = vmatpush3.bf16.msra.mxu1 %v682_v32 }
 0x14a   :  { %637 = vmatprep.subr.bf16.mxu1 %v843_v0 }
 0x14d   :  { %638 = vmatpush3.bf16.msra.mxu1 %v683_v33 }
 0x14e   :  { %639 = vmatprep.subr.bf16.mxu1 %v843_v0 }
 0x151   :  { %640 = vmatpush3.bf16.msra.mxu1 %v684_v34 }
 0x152   :  { %641 = vmatprep.subr.bf16.mxu1 %v843_v0 }
 0x155   :  { %642 = vmatpush3.bf16.msra.mxu1 %v685_v47 }
 0x156   :  { %643 = vmatprep.subr.bf16.mxu1 %v843_v0 }
 0x159   :  { %644 = vmatpush3.bf16.msra.mxu1 %v686_v48 }
 0x15a   :  { %645 = vmatprep.subr.bf16.mxu1 %v843_v0 }
 0x15d   :  { %646 = vmatpush3.bf16.msra.mxu1 %v687_v49 }
 0x15e   :  { %647 = vmatprep.subr.bf16.mxu1 %v843_v0 }
 0x161   :  { %648 = vmatpush3.bf16.msra.mxu1 %v688_v50 }
 0x162   :  { %649 = vmatprep.subr.bf16.mxu1 %v843_v0  ;;  %v551_v0 = vld [vmem:[%s1033_s8] ss:$0 sm:$0xff] }
 0x165   :  { %650 = vmatpush3.bf16.msra.mxu1 %v689_v51 }
 0x21b   :  { %v272_v36 = vpop.f32.mrb[0].mxu1 }
 0x21c   :  { %v273_v37 = vadd.f32 %v533_v35, %v272_v36  ;;  %v613_v38 = vpop.f32.mrb[1].mxu1 }
 0x21d   :  { %v275_v39 = vpop.f32.mrb[2].mxu1 }
 0x21e   :  { %v279_v40 = vmul.f32 0.70710677, %v273_v37  ;;  %v614_v41 = vpop.f32.mrb[3].mxu1  ;;  %v278_v43 = vmul.f32 0.5, %v273_v37 }
 0x220   :  { %692 = verf.f32 %v279_v40 }
 0x22a   :  { %v693_v42 = vpop.eup %692 }
 0x22b   :  { %v281_v44 = vadd.f32 1.0, %v693_v42 }
 0x22d   :  { %v282_v45 = vmul.f32 %v281_v44, %v278_v43 }
 0x22f   :  { %v283_v46 = vpack.c.bf16 %v282_v45, %v282_v45 }
 0x231   :  { %632 = vmatmul.mubr.bf16.vlgmr.msra.gmra.mrb[4].mxu0 %v283_v46 }
 0x304   :  { %v389_v53 = vpop.f32.mrb[4].mxu0 }
 0x305   :  { %v390_v54 = vadd.f32 %v542_v52, %v389_v53  ;;  %v633_v55 = vpop.f32.mrb[5].mxu0 }
 0x306   :  { %v392_v56 = vpop.f32.mrb[6].mxu0 }
 0x307   :  { %v396_v57 = vmul.f32 0.70710677, %v390_v54  ;;  %v634_v58 = vpop.f32.mrb[7].mxu0  ;;  %v395_v60 = vmul.f32 0.5, %v390_v54 }
 0x309   :  { %694 = verf.f32 %v396_v57 }
 0x313   :  { %v695_v59 = vpop.eup %694 }
 0x314   :  { %v398_v61 = vadd.f32 1.0, %v695_v59 }
 0x316   :  { %v399_v62 = vmul.f32 %v398_v61, %v395_v60 }
 0x318   :  { %v400_v63 = vpack.c.bf16 %v399_v62, %v399_v62 }
 0x31a   :  { %652 = vmatmul.mubr.bf16.vlgmr.msra.gmra.mrb[4].mxu1 %v400_v63 }
 0x3ed   :  { %v506_v1 = vpop.f32.mrb[4].mxu1 }
 0x3ee   :  { %v507_v2 = vadd.f32 %v551_v0, %v506_v1  ;;  %v653_v3 = vpop.f32.mrb[5].mxu1 }
 0x3ef   :  { %v509_v4 = vpop.f32.mrb[6].mxu1 }
 0x3f0   :  { %512 = vst [vmem:[#allocation11] sm:$0xff] %v507_v2  ;;  %v654_v5 = vpop.f32.mrb[7].mxu1 }
 0x3f1   :  { %817 = shalt.err (!%p814_p2)
}
 0x3f2   :  { %s818_s8 = scalar_lea.hbm %s1034_s9, 128 }
 0x3f3   :  { %p819_p3 = scmp.ne.s32.totalorder %s1034_s9, %s818_s8  ;;  %p822_p4 = scmp.lt.u32.totalorder %s818_s8, %s1034_s9 }
 0x3f5   :  { %p824_p5 = pnand %p822_p4, %p819_p3 }
 0x3f7   :  { %827 = shalt.err (!%p824_p5)
}
 0x3f8   :  { %522 = dma.vmem_to_hbm [thread:$0]  %s520_s12, 128, %s1034_s9, [#allocation4]  }
 0x3f9   :  { %834 = dma.done.wait [#allocation4], 128  }
 0x3fa   :  { %835 = vsyncadd [#allocation4], 4294967168 }
 0x3fb   :  { %526 = vsyncpa [#allocation3], 1 }
 0x3fc   :  { %527 = vsyncpa [#allocation6], 1 }
 0x3fd   :  { %528 = vsyncpa [#allocation9], 1 }
 0x3fe   :  { %529 = vsyncpa [#allocation4], 1 }

// kernel: tpu_custom_call.1
= control target key start
LH: loop header
LB: loop body
LE: loop exit
PB: predicated region body
PF: predicated region fallthrough
CT: control target
= control target key end

     0   :  { %14 = vsyncpa [#allocation3], 0  ;;  %s1025_s0 = inlined_call_operand.hbm [shape: f32[8,16], index: 0, kind: input, shape index: {}]   ;;  %s1026_s1 = inlined_call_operand.hbm [shape: bf16[16,128], index: 1, kind: input, shape index: {}]   ;;  %s1027_s2 = inlined_call_operand.vmem [shape: f32[1,128], index: 2, kind: input, shape index: {}]   ;;  %s1028_s3 = inlined_call_operand.hbm [shape: bf16[128,128], index: 3, kind: input, shape index: {}]   ;;  %s1029_s4 = inlined_call_operand.vmem [shape: f32[1,128], index: 4, kind: input, shape index: {}]   ;;  %s1030_s5 = inlined_call_operand.hbm [shape: bf16[128,128], index: 5, kind: input, shape index: {}]   ;;  %s1031_s6 = inlined_call_operand.vmem [shape: f32[1,128], index: 6, kind: input, shape index: {}]   ;;  %s1032_s7 = inlined_call_operand.hbm [shape: bf16[128,128], index: 7, kind: input, shape index: {}]   ;;  %s1033_s8 = inlined_call_operand.vmem [shape: f32[1,128], index: 8, kind: input, shape index: {}]   ;;  %s1034_s9 = inlined_call_operand.hbm [shape: f32[8,128], index: 9, kind: output, shape index: {}]  }
   0x1   :  { %15 = vsyncpa [#allocation6], 0 }
   0x2   :  { %16 = vsyncpa [#allocation9], 0 }
   0x3   :  { %17 = vsyncpa [#allocation4], 0  ;;  %s836_s30 = smov [#allocation5]   ;;  %s696_s13 = scalar_lea.hbm %s1026_s1, 128 }
   0x4   :  { %s33_s10 = sshll.u32 %s836_s30, 4  ;;  %p697_p0 = scmp.ne.s32.totalorder %s1026_s1, %s696_s13  ;;  %s34_s10 = int_to_ptr.vmem [resolvable:$true] %s33_s10 }
   0x5   :  { %p700_p1 = scmp.lt.u32.totalorder %s696_s13, %s1026_s1 }
   0x7   :  { %p702_p2 = pnand %p700_p1, %p697_p0 }
   0x9   :  { %705 = shalt.err (!%p702_p2)
}
   0xa   :  { %s706_s18 = scalar_lea.vmem %s34_s10, 128  ;;  %p711_p4 = scmp.lt.s32.totalorder %s34_s10, %s34_s10 }
   0xb   :  { %p707_p3 = scmp.ne.s32.totalorder %s34_s10, %s706_s18  ;;  %p712_p5 = scmp.lt.s32.totalorder %s706_s18, %s706_s18 }
   0xd   :  { %p713_p6 = por %p712_p5, %p711_p4 }
   0xf   :  { %p714_p7 = pnand %p713_p6, %p707_p3 }
  0x11   :  { %717 = shalt.err (!%p714_p7)
}
  0x12   :  { %s837_s19 = smov 64   ;;  %s838_s20 = smov 4  }
  0x13   :  { %39 = dma.hbm_to_vmem [thread:$0]  %s1026_s1, 128, %s34_s10, [#allocation6], %s837_s19, %s837_s19, %s838_s20  }
  0x14   :  { %s839_s23 = smov [#allocation8]   ;;  %s840_s25 = smov [#allocation2]  }
  0x15   :  { %s61_s24 = sshll.u32 %s839_s23, 4  ;;  %s24_s26 = sshll.u32 %s840_s25, 4  ;;  %s62_s24 = int_to_ptr.vmem [resolvable:$true] %s61_s24  ;;  %s25_s26 = int_to_ptr.vmem [resolvable:$true] %s24_s26 }
  0x16   :  { %s718_s29 = scalar_lea.hbm %s1030_s5, 1024 }
  0x17   :  { %p719_p8 = scmp.ne.s32.totalorder %s1030_s5, %s718_s29  ;;  %p722_p9 = scmp.lt.u32.totalorder %s718_s29, %s1030_s5 }
  0x19   :  { %p724_p10 = pnand %p722_p9, %p719_p8 }
  0x1b   :  { %727 = shalt.err (!%p724_p10)
}
  0x1c   :  { %s728_s1 = scalar_lea.vmem %s62_s24, 1024  ;;  %p733_p12 = scmp.lt.s32.totalorder %s62_s24, %s62_s24 }
  0x1d   :  { %p729_p11 = scmp.ne.s32.totalorder %s62_s24, %s728_s1  ;;  %p734_p13 = scmp.lt.s32.totalorder %s728_s1, %s728_s1 }
  0x1f   :  { %p735_p0 = por %p734_p13, %p733_p12 }
  0x21   :  { %p736_p1 = pnand %p735_p0, %p729_p11 }
  0x23   :  { %739 = shalt.err (!%p736_p1)
}
  0x24   :  { %67 = dma.hbm_to_vmem [thread:$0]  %s1030_s5, 1024, %s62_s24, [#allocation9], %s837_s19, %s837_s19, %s838_s20  }
  0x25   :  { %s740_s17 = scalar_lea.hbm %s1025_s0, 128 }
  0x26   :  { %p741_p2 = scmp.ne.s32.totalorder %s1025_s0, %s740_s17  ;;  %p744_p3 = scmp.lt.u32.totalorder %s740_s17, %s1025_s0 }
  0x28   :  { %p746_p4 = pnand %p744_p3, %p741_p2 }
  0x2a   :  { %749 = shalt.err (!%p746_p4)
}
  0x2b   :  { %s750_s25 = scalar_lea.vmem %s25_s26, 128  ;;  %p755_p6 = scmp.lt.s32.totalorder %s25_s26, %s25_s26 }
  0x2c   :  { %p751_p5 = scmp.ne.s32.totalorder %s25_s26, %s750_s25  ;;  %p756_p7 = scmp.lt.s32.totalorder %s750_s25, %s750_s25 }
  0x2e   :  { %p757_p8 = por %p756_p7, %p755_p6 }
  0x30   :  { %p758_p9 = pnand %p757_p8, %p751_p5 }
  0x32   :  { %761 = shalt.err (!%p758_p9)
}
  0x33   :  { %27 = dma.hbm_to_vmem [thread:$0]  %s1025_s0, 128, %s25_s26, [#allocation3]  }
  0x34   :  { %s841_s27 = smov [#allocation7]   ;;  %s842_s29 = smov [#allocation10]  }
  0x35   :  { %s47_s28 = sshll.u32 %s841_s27, 4  ;;  %s75_s30 = sshll.u32 %s842_s29, 4  ;;  %s48_s28 = int_to_ptr.vmem [resolvable:$true] %s47_s28  ;;  %s76_s30 = int_to_ptr.vmem [resolvable:$true] %s75_s30 }
  0x36   :  { %s762_s13 = scalar_lea.hbm %s1028_s3, 1024 }
  0x37   :  { %p763_p10 = scmp.ne.s32.totalorder %s1028_s3, %s762_s13  ;;  %p766_p11 = scmp.lt.u32.totalorder %s762_s13, %s1028_s3 }
  0x39   :  { %p768_p12 = pnand %p766_p11, %p763_p10 }
  0x3b   :  { %771 = shalt.err (!%p768_p12)
}
  0x3c   :  { %s772_s0 = scalar_lea.vmem %s48_s28, 1024  ;;  %p777_p0 = scmp.lt.s32.totalorder %s48_s28, %s48_s28 }
  0x3d   :  { %p773_p13 = scmp.ne.s32.totalorder %s48_s28, %s772_s0  ;;  %p778_p1 = scmp.lt.s32.totalorder %s772_s0, %s772_s0 }
  0x3f   :  { %p779_p2 = por %p778_p1, %p777_p0 }
  0x41   :  { %p780_p3 = pnand %p779_p2, %p773_p13 }
  0x43   :  { %783 = shalt.err (!%p780_p3)
}
  0x44   :  { %53 = dma.hbm_to_vmem [thread:$0]  %s1028_s3, 1024, %s48_s28, [#allocation6], %s837_s19, %s837_s19, %s838_s20  }
  0x45   :  { %s784_s21 = scalar_lea.hbm %s1032_s7, 1024 }
  0x46   :  { %p785_p4 = scmp.ne.s32.totalorder %s1032_s7, %s784_s21  ;;  %p788_p5 = scmp.lt.u32.totalorder %s784_s21, %s1032_s7 }
  0x48   :  { %p790_p6 = pnand %p788_p5, %p785_p4 }
  0x4a   :  { %793 = shalt.err (!%p790_p6)
}
  0x4b   :  { %s794_s24 = scalar_lea.vmem %s76_s30, 1024  ;;  %p799_p8 = scmp.lt.s32.totalorder %s76_s30, %s76_s30 }
  0x4c   :  { %p795_p7 = scmp.ne.s32.totalorder %s76_s30, %s794_s24  ;;  %p800_p9 = scmp.lt.s32.totalorder %s794_s24, %s794_s24 }
  0x4e   :  { %p801_p10 = por %p800_p9, %p799_p8 }
  0x50   :  { %p802_p11 = pnand %p801_p10, %p795_p7 }
  0x52   :  { %805 = shalt.err (!%p802_p11)
}
  0x53   :  { %81 = dma.hbm_to_vmem [thread:$0]  %s1032_s7, 1024, %s76_s30, [#allocation9], %s837_s19, %s837_s19, %s838_s20  }
  0x54   :  { %828 = dma.done.wait [#allocation3], 128  }
  0x55   :  { %829 = vsyncadd [#allocation3], 4294967168 }
  0x56   :  { %830 = dma.done.wait [#allocation6], 1152  }
  0x57   :  { %831 = vsyncadd [#allocation6], 4294966144 }
  0x58   :  { %832 = dma.done.wait [#allocation9], 2048  }
  0x59   :  { %833 = vsyncadd [#allocation9], 4294965248  ;;  %v843_v0 = vmov 0.0   ;;  %vm844_vm0 = vmmov 0   ;;  %v665_v1 = vld [vmem:[#allocation5] sm:$0xff]   ;;  %v100_v2 = vld [vmem:[#allocation2] sm:$0xff] }
  0x5a   :  { %589 = vmatprep.subr.bf16.mxu0 %v843_v0  ;;  %591 = vmatprep.mubr.msk.bf16.mxu0 %vm844_vm0, %v843_v0  ;;  %v101_v3 = vpack.c.bf16 %v100_v2, %v100_v2  ;;  %vm117_vm1 = vcmask 130048   ;;  %v666_v4 = vld [vmem:[#allocation7] sm:$0xff]   ;;  %v667_v5 = vld [vmem:[#allocation7 + $0x8] sm:$0xff]   ;;  %v668_v6 = vld [vmem:[#allocation7 + $0x10] sm:$0xff]   ;;  %s845_s11 = smov [#allocation11]  }
  0x5b   :  { %595 = vmatprep.subr.bf16.mxu1 %v843_v0  ;;  %611 = vmatprep.mubr.msk.bf16.mxu1 %vm844_vm0, %v843_v0  ;;  %v669_v7 = vld [vmem:[#allocation7 + $0x18] sm:$0xff]   ;;  %v670_v8 = vld [vmem:[#allocation7 + $0x20] sm:$0xff]   ;;  %v671_v9 = vld [vmem:[#allocation7 + $0x28] sm:$0xff]   ;;  %s519_s12 = sshll.u32 %s845_s11, 4  ;;  %s520_s12 = int_to_ptr.vmem [resolvable:$true] %s519_s12 }
  0x5c   :  { %590 = vmatpush3.bf16.msra.mxu0 %v665_v1  ;;  %596 = vmatpush3.bf16.msra.mxu1 %v666_v4  ;;  %v672_v10 = vld [vmem:[#allocation7 + $0x30] sm:$0xff]   ;;  %v673_v11 = vld [vmem:[#allocation7 + $0x38] sm:$0xff]   ;;  %v674_v12 = vld [vmem:[#allocation8] sm:$0xff]   ;;  %p811_p13 = scmp.lt.s32.totalorder %s520_s12, %s520_s12 }
  0x5d   :  { %615 = vmatprep.subr.bf16.mxu0 %v843_v0  ;;  %597 = vmatprep.subr.bf16.mxu1 %v843_v0  ;;  %v675_v13 = vld [vmem:[#allocation8 + $0x8] sm:$0xff]   ;;  %v676_v14 = vld [vmem:[#allocation8 + $0x10] sm:$0xff]   ;;  %v677_v27 = vld [vmem:[#allocation8 + $0x18] sm:$0xff]  }
  0x5e   :  { %v530_v15 = vld [vmem:[%s1027_s2] ss:$0 sm:$0xff]  ;;  %v678_v28 = vld [vmem:[#allocation8 + $0x20] sm:$0xff]   ;;  %v679_v29 = vld [vmem:[#allocation8 + $0x28] sm:$0xff]  }
  0x5f   :  { %592 = vmatmul.mubr.msk.bf16.vlgmr.msra.gmra.mrb[0].mxu0 %vm117_vm1, %v101_v3  ;;  %v680_v30 = vld [vmem:[#allocation8 + $0x30] sm:$0xff]   ;;  %v681_v31 = vld [vmem:[#allocation8 + $0x38] sm:$0xff]   ;;  %v682_v32 = vld [vmem:[#allocation10] sm:$0xff]  }
  0x60   :  { %631 = vmatprep.mubr.msk.bf16.mxu0 %vm844_vm0, %v843_v0  ;;  %598 = vmatpush3.bf16.msra.mxu1 %v667_v5  ;;  %v683_v33 = vld [vmem:[#allocation10 + $0x8] sm:$0xff]   ;;  %v684_v34 = vld [vmem:[#allocation10 + $0x10] sm:$0xff]   ;;  %v685_v47 = vld [vmem:[#allocation10 + $0x18] sm:$0xff]  }
  0x61   :  { %599 = vmatprep.subr.bf16.mxu1 %v843_v0  ;;  %616 = vmatpush3.bf16.msra.mxu0 %v674_v12  ;;  %v533_v35 = vld [vmem:[%s1029_s4] ss:$0 sm:$0xff]  ;;  %v686_v48 = vld [vmem:[#allocation10 + $0x20] sm:$0xff]   ;;  %v687_v49 = vld [vmem:[#allocation10 + $0x28] sm:$0xff]  }
  0x62   :  { %617 = vmatprep.subr.bf16.mxu0 %v843_v0  ;;  %v688_v50 = vld [vmem:[#allocation10 + $0x30] sm:$0xff]   ;;  %v689_v51 = vld [vmem:[#allocation10 + $0x38] sm:$0xff]  }
  0x63   :  { %v542_v52 = vld [vmem:[%s1031_s6] ss:$0 sm:$0xff]  ;;  %s806_s6 = scalar_lea.vmem %s520_s12, 128 }
  0x64   :  { %600 = vmatpush3.bf16.msra.mxu1 %v668_v6  ;;  %p807_p12 = scmp.ne.s32.totalorder %s520_s12, %s806_s6  ;;  %p812_p0 = scmp.lt.s32.totalorder %s806_s6, %s806_s6 }
  0x65   :  { %601 = vmatprep.subr.bf16.mxu1 %v843_v0  ;;  %618 = vmatpush3.bf16.msra.mxu0 %v675_v13 }
  0x66   :  { %619 = vmatprep.subr.bf16.mxu0 %v843_v0  ;;  %p813_p1 = por %p812_p0, %p811_p13 }
  0x68   :  { %602 = vmatpush3.bf16.msra.mxu1 %v669_v7  ;;  %p814_p2 = pnand %p813_p1, %p807_p12 }
  0x69   :  { %603 = vmatprep.subr.bf16.mxu1 %v843_v0  ;;  %620 = vmatpush3.bf16.msra.mxu0 %v676_v14 }
  0x6a   :  { %621 = vmatprep.subr.bf16.mxu0 %v843_v0 }
  0x6c   :  { %604 = vmatpush3.bf16.msra.mxu1 %v670_v8 }
  0x6d   :  { %605 = vmatprep.subr.bf16.mxu1 %v843_v0  ;;  %622 = vmatpush3.bf16.msra.mxu0 %v677_v27 }
  0x6e   :  { %623 = vmatprep.subr.bf16.mxu0 %v843_v0 }
  0x70   :  { %606 = vmatpush3.bf16.msra.mxu1 %v671_v9 }
  0x71   :  { %607 = vmatprep.subr.bf16.mxu1 %v843_v0  ;;  %624 = vmatpush3.bf16.msra.mxu0 %v678_v28 }
  0x72   :  { %625 = vmatprep.subr.bf16.mxu0 %v843_v0 }
  0x74   :  { %608 = vmatpush3.bf16.msra.mxu1 %v672_v10 }
  0x75   :  { %609 = vmatprep.subr.bf16.mxu1 %v843_v0  ;;  %626 = vmatpush3.bf16.msra.mxu0 %v679_v29 }
  0x76   :  { %627 = vmatprep.subr.bf16.mxu0 %v843_v0 }
  0x78   :  { %610 = vmatpush3.bf16.msra.mxu1 %v673_v11 }
  0x79   :  { %635 = vmatprep.subr.bf16.mxu1 %v843_v0  ;;  %628 = vmatpush3.bf16.msra.mxu0 %v680_v30 }
  0x7a   :  { %629 = vmatprep.subr.bf16.mxu0 %v843_v0 }
  0x7d   :  { %630 = vmatpush3.bf16.msra.mxu0 %v681_v31 }
 0x132   :  { %v155_v16 = vpop.f32.mrb[0].mxu0 }
 0x133   :  { %v156_v17 = vadd.f32 %v530_v15, %v155_v16  ;;  %v593_v18 = vpop.f32.mrb[1].mxu0 }
 0x134   :  { %v158_v19 = vpop.f32.mrb[2].mxu0 }
 0x135   :  { %v162_v20 = vmul.f32 0.70710677, %v156_v17  ;;  %v594_v21 = vpop.f32.mrb[3].mxu0  ;;  %v161_v23 = vmul.f32 0.5, %v156_v17 }
 0x137   :  { %690 = verf.f32 %v162_v20 }
 0x141   :  { %v691_v22 = vpop.eup %690 }
 0x142   :  { %v164_v24 = vadd.f32 1.0, %v691_v22 }
 0x144   :  { %v165_v25 = vmul.f32 %v164_v24, %v161_v23 }
 0x146   :  { %v166_v26 = vpack.c.bf16 %v165_v25, %v165_v25 }
 0x148   :  { %612 = vmatmul.mubr.bf16.vlgmr.msra.gmra.mrb[0].mxu1 %v166_v26 }
 0x149   :  { %651 = vmatprep.mubr.msk.bf16.mxu1 %vm844_vm0, %v843_v0  ;;  %636 = vmatpush3.bf16.msra.mxu1 %v682_v32 }
 0x14a   :  { %637 = vmatprep.subr.bf16.mxu1 %v843_v0 }
 0x14d   :  { %638 = vmatpush3.bf16.msra.mxu1 %v683_v33 }
 0x14e   :  { %639 = vmatprep.subr.bf16.mxu1 %v843_v0 }
 0x151   :  { %640 = vmatpush3.bf16.msra.mxu1 %v684_v34 }
 0x152   :  { %641 = vmatprep.subr.bf16.mxu1 %v843_v0 }
 0x155   :  { %642 = vmatpush3.bf16.msra.mxu1 %v685_v47 }
 0x156   :  { %643 = vmatprep.subr.bf16.mxu1 %v843_v0 }
 0x159   :  { %644 = vmatpush3.bf16.msra.mxu1 %v686_v48 }
 0x15a   :  { %645 = vmatprep.subr.bf16.mxu1 %v843_v0 }
 0x15d   :  { %646 = vmatpush3.bf16.msra.mxu1 %v687_v49 }
 0x15e   :  { %647 = vmatprep.subr.bf16.mxu1 %v843_v0 }
 0x161   :  { %648 = vmatpush3.bf16.msra.mxu1 %v688_v50 }
 0x162   :  { %649 = vmatprep.subr.bf16.mxu1 %v843_v0  ;;  %v551_v0 = vld [vmem:[%s1033_s8] ss:$0 sm:$0xff] }
 0x165   :  { %650 = vmatpush3.bf16.msra.mxu1 %v689_v51 }
 0x21b   :  { %v272_v36 = vpop.f32.mrb[0].mxu1 }
 0x21c   :  { %v273_v37 = vadd.f32 %v533_v35, %v272_v36  ;;  %v613_v38 = vpop.f32.mrb[1].mxu1 }
 0x21d   :  { %v275_v39 = vpop.f32.mrb[2].mxu1 }
 0x21e   :  { %v279_v40 = vmul.f32 0.70710677, %v273_v37  ;;  %v614_v41 = vpop.f32.mrb[3].mxu1  ;;  %v278_v43 = vmul.f32 0.5, %v273_v37 }
 0x220   :  { %692 = verf.f32 %v279_v40 }
 0x22a   :  { %v693_v42 = vpop.eup %692 }
 0x22b   :  { %v281_v44 = vadd.f32 1.0, %v693_v42 }
 0x22d   :  { %v282_v45 = vmul.f32 %v281_v44, %v278_v43 }
 0x22f   :  { %v283_v46 = vpack.c.bf16 %v282_v45, %v282_v45 }
 0x231   :  { %632 = vmatmul.mubr.bf16.vlgmr.msra.gmra.mrb[4].mxu0 %v283_v46 }
 0x304   :  { %v389_v53 = vpop.f32.mrb[4].mxu0 }
 0x305   :  { %v390_v54 = vadd.f32 %v542_v52, %v389_v53  ;;  %v633_v55 = vpop.f32.mrb[5].mxu0 }
 0x306   :  { %v392_v56 = vpop.f32.mrb[6].mxu0 }
 0x307   :  { %v396_v57 = vmul.f32 0.70710677, %v390_v54  ;;  %v634_v58 = vpop.f32.mrb[7].mxu0  ;;  %v395_v60 = vmul.f32 0.5, %v390_v54 }
 0x309   :  { %694 = verf.f32 %v396_v57 }
 0x313   :  { %v695_v59 = vpop.eup %694 }
 0x314   :  { %v398_v61 = vadd.f32 1.0, %v695_v59 }
 0x316   :  { %v399_v62 = vmul.f32 %v398_v61, %v395_v60 }
 0x318   :  { %v400_v63 = vpack.c.bf16 %v399_v62, %v399_v62 }
 0x31a   :  { %652 = vmatmul.mubr.bf16.vlgmr.msra.gmra.mrb[4].mxu1 %v400_v63 }
 0x3ed   :  { %v506_v1 = vpop.f32.mrb[4].mxu1 }
 0x3ee   :  { %v507_v2 = vadd.f32 %v551_v0, %v506_v1  ;;  %v653_v3 = vpop.f32.mrb[5].mxu1 }
 0x3ef   :  { %v509_v4 = vpop.f32.mrb[6].mxu1 }
 0x3f0   :  { %512 = vst [vmem:[#allocation11] sm:$0xff] %v507_v2  ;;  %v654_v5 = vpop.f32.mrb[7].mxu1 }
 0x3f1   :  { %817 = shalt.err (!%p814_p2)
}
 0x3f2   :  { %s818_s8 = scalar_lea.hbm %s1034_s9, 128 }
 0x3f3   :  { %p819_p3 = scmp.ne.s32.totalorder %s1034_s9, %s818_s8  ;;  %p822_p4 = scmp.lt.u32.totalorder %s818_s8, %s1034_s9 }
 0x3f5   :  { %p824_p5 = pnand %p822_p4, %p819_p3 }
 0x3f7   :  { %827 = shalt.err (!%p824_p5)
}
 0x3f8   :  { %522 = dma.vmem_to_hbm [thread:$0]  %s520_s12, 128, %s1034_s9, [#allocation4]  }
 0x3f9   :  { %834 = dma.done.wait [#allocation4], 128  }
 0x3fa   :  { %835 = vsyncadd [#allocation4], 4294967168 }
 0x3fb   :  { %526 = vsyncpa [#allocation3], 1 }
 0x3fc   :  { %527 = vsyncpa [#allocation6], 1 }
 0x3fd   :  { %528 = vsyncpa [#allocation9], 1 }
 0x3fe   :  { %529 = vsyncpa [#allocation4], 1 }

</bundles_post_ra>
